<compile_context>
chip_gen: v7x
topology: tpu7x:2x2x1
jax: 0.10.0
libtpu: 0.0.40
codegen_flags: <defaults>
</compile_context>

<pallas_src>
import functools
import math

import jax
import jax.numpy as jnp
from jax import lax
from jax.experimental import pallas as pl
from jax.experimental.pallas import tpu as pltpu

_GELU_C = math.sqrt(2.0 / math.pi)


def _gelu_tanh(h):
    # 0.5*h*(1 + tanh(sqrt(2/pi) * h * (1 + 0.044715*h^2))) — tanh runs on EUP;
    # fused polynomial form drops one multiply vs (h + 0.044715*h^3).
    return 0.5 * h * (1.0 + jnp.tanh(_GELU_C * h * (1.0 + 0.044715 * (h * h))))


# ----------------------------------------------------------------------------
# Kernels
# ----------------------------------------------------------------------------
def ffn_resident_kernel(x_ref, w1_ref, b1_ref, w2_ref, b2_ref, o_ref, acc_ref,
                        *, tn, act_dtype):
    """Weights fully VMEM-resident; in-kernel loop over ff chunks of width tn."""
    n_ff = w1_ref.shape[1] // tn          # static
    acc_ref[...] = jnp.zeros_like(acc_ref)
    x = x_ref[...]                        # hoist the row-tile load out of the loop

    def body(j, carry):
        start = pl.multiple_of(j * tn, tn)           # tn is a multiple of 128
        h = jnp.dot(x, w1_ref[:, pl.ds(start, tn)],
                    preferred_element_type=jnp.float32)
        h = _gelu_tanh((h + b1_ref[:, pl.ds(start, tn)]).astype(act_dtype))
        acc_ref[...] += jnp.dot(h.astype(w2_ref.dtype),
                                w2_ref[pl.ds(start, tn), :],
                                preferred_element_type=jnp.float32)
        return carry

    lax.fori_loop(0, n_ff, body, 0, unroll=(n_ff <= 8))
    o_ref[...] = (acc_ref[...] + b2_ref[...]).astype(o_ref.dtype)


def ffn_stream_kernel(x_ref, w1_ref, b1_ref, w2_ref, b2_ref, o_ref, acc_ref,
                      *, act_dtype):
    """Streaming fallback: 2-D grid, ff reduction axis innermost ("arbitrary")."""
    j = pl.program_id(1)

    @pl.when(j == 0)
    def _():
        acc_ref[...] = jnp.zeros_like(acc_ref)

    h = jnp.dot(x_ref[...], w1_ref[...], preferred_element_type=jnp.float32)
    h = _gelu_tanh((h + b1_ref[...]).astype(act_dtype))
    acc_ref[...] += jnp.dot(h.astype(w2_ref.dtype), w2_ref[...],
                            preferred_element_type=jnp.float32)

    @pl.when(j == pl.num_programs(1) - 1)
    def _():
        o_ref[...] = (acc_ref[...] + b2_ref[...]).astype(o_ref.dtype)


# ----------------------------------------------------------------------------
# Helpers
# ----------------------------------------------------------------------------
def _round_up(x, m):
    return ((x + m - 1) // m) * m


def _pick_tm(m, candidates):
    m8 = _round_up(max(m, 1), 8)
    for t in candidates:
        if t <= m8:
            return t
    return 8


def _pick_div(dim, candidates):
    for t in candidates:
        if dim % t == 0:
            return t
    return 128  # dim is always a multiple of 128 here, so this never misfires


def _tpu_vmem_bytes():
    # Per-core physical VMEM (128 MiB on v5e/v6e, 64 MiB on v7x).
    try:
        info = pltpu.get_tpu_info()
        for attr in ("vmem_capacity_bytes", "vmem_bytes", "vmem_size_bytes"):
            v = getattr(info, attr, None)
            if v:
                return int(v)
    except Exception:
        pass
    return 128 * 1024 * 1024


# ----------------------------------------------------------------------------
# Wrapper
# ----------------------------------------------------------------------------
def feed_forward(x, w1, b1, w2, b2, *, force_path=None):
    """x: (B, S, D); w1: (D, Dff); b1: (Dff,) or (1, Dff); w2: (Dff, D); b2: (D,) or (1, D)."""
    B, S, D = x.shape
    Dff = w1.shape[1]
    assert w1.shape == (D, Dff) and w2.shape == (Dff, D)
    b1 = jnp.asarray(b1).reshape(1, -1)
    b2 = jnp.asarray(b2).reshape(1, -1)

    M = B * S
    x2d = x.reshape(M, D)
    out_dtype = x.dtype

    # --- ff (inner) dim padded to a lane-dense multiple of 128 (exact math:
    #     padded columns/rows contribute zero). -------------------------------
    Dff_pad = _round_up(Dff, 128)
    if Dff_pad != Dff:
        w1 = jnp.pad(w1, ((0, 0), (0, Dff_pad - Dff)))
        b1 = jnp.pad(b1, ((0, 0), (0, Dff_pad - Dff)))
        w2 = jnp.pad(w2, ((0, Dff_pad - Dff), (0, 0)))
    # TODO(synk): for production shapes, D (hidden) should also be a multiple
    # of 128 so (tm, D) output stores stay lane-dense (unmasked vst).

    # --- per-generation VMEM budget (v5e scoped default is only 16 MiB; v7x
    #     has 64 MiB physical) — set it explicitly. ---------------------------
    vmem_phys = _tpu_vmem_bytes()
    vmem_limit = int(vmem_phys * 0.75)

    itemsize = lambda a: jnp.dtype(a.dtype).itemsize
    out_isz = jnp.dtype(out_dtype).itemsize

    # ff chunk width (shared by both paths).
    tn = _pick_div(Dff_pad, (512, 256, 128))

    # Weight-resident eligibility (weights double-buffered worst case + a
    # nominal tm=256 row tile + accumulator + activation slab).
    wbytes = (D * Dff_pad * itemsize(w1) + Dff_pad * D * itemsize(w2)
              + Dff_pad * itemsize(b1) + D * itemsize(b2))
    resident_est = (2 * (wbytes + 256 * D * (itemsize(x2d) + out_isz))
                    + 256 * D * 4 + 256 * tn * 4)
    use_resident = resident_est <= int(0.6 * vmem_limit)
    if force_path == "resident":
        use_resident = True
    elif force_path == "stream":
        use_resident = False

    # bf16 bias+GELU halves VPU/EUP work on v6e/v7x; keep f32 for f32 weights.
    # TODO(synk): on v5e (no bf16 VPU/EUP) keep f32 even with bf16 weights.
    act_dtype = jnp.bfloat16 if w2.dtype == jnp.bfloat16 else jnp.float32

    # --- row tile ------------------------------------------------------------
    tm_candidates = (512, 256, 128, 64, 32, 16, 8) if use_resident else \
                    (1024, 512, 256, 128, 64, 32, 16, 8)
    tm = _pick_tm(M, tm_candidates)
    # Keep >= 2 row tiles when possible so the "parallel" axis can split across
    # v7x's two TensorCores.
    if pl.cdiv(M, tm) < 2 and tm > 8:
        tm = max(8, tm // 2)

    if not use_resident:
        # Shrink tn, then tm, until the per-step working set fits the budget.
        def step_bytes(tm_, tn_):
            return (2 * (tm_ * D * itemsize(x2d)
                         + D * tn_ * itemsize(w1) + tn_ * itemsize(b1)
                         + tn_ * D * itemsize(w2) + D * itemsize(b2)
                         + tm_ * D * out_isz)
                    + tm_ * D * 4 + tm_ * tn_ * 4)
        while step_bytes(tm, tn) > int(0.8 * vmem_limit) and tn > 128:
            tn //= 2
        while step_bytes(tm, tn) > int(0.8 * vmem_limit) and tm > 8:
            tm = max(8, tm // 2)

    M_pad = _round_up(M, tm)
    if M_pad != M:
        x2d = jnp.pad(x2d, ((0, M_pad - M), (0, 0)))

    if use_resident:
        kernel = functools.partial(ffn_resident_kernel, tn=tn, act_dtype=act_dtype)
        out2d = pl.pallas_call(
            kernel,
            out_shape=jax.ShapeDtypeStruct((M_pad, D), out_dtype),
            grid=(M_pad // tm,),
            in_specs=[
                pl.BlockSpec((tm, D), lambda i: (i, 0)),          # x row tile
                pl.BlockSpec((D, Dff_pad), lambda i: (0, 0)),     # W1, resident
                pl.BlockSpec((1, Dff_pad), lambda i: (0, 0)),     # b1, resident
                pl.BlockSpec((Dff_pad, D), lambda i: (0, 0)),     # W2, resident
                pl.BlockSpec((1, D), lambda i: (0, 0)),           # b2, resident
            ],
            out_specs=pl.BlockSpec((tm, D), lambda i: (i, 0)),
            scratch_shapes=[pltpu.VMEM((tm, D), jnp.float32)],
            compiler_params=pltpu.CompilerParams(
                dimension_semantics=("parallel",),
                vmem_limit_bytes=vmem_limit,
            ),
        )(x2d, w1, b1, w2, b2)
    else:
        kernel = functools.partial(ffn_stream_kernel, act_dtype=act_dtype)
        grid = (M_pad // tm, Dff_pad // tn)
        out2d = pl.pallas_call(
            kernel,
            out_shape=jax.ShapeDtypeStruct((M_pad, D), out_dtype),
            grid=grid,
            in_specs=[
                pl.BlockSpec((tm, D), lambda i, j: (i, 0)),       # x row tile
                pl.BlockSpec((D, tn), lambda i, j: (0, j)),       # W1 ff-column tile
                pl.BlockSpec((1, tn), lambda i, j: (0, j)),       # b1 tile
                pl.BlockSpec((tn, D), lambda i, j: (j, 0)),       # W2 ff-row tile
                pl.BlockSpec((1, D), lambda i, j: (0, 0)),        # b2 (constant block)
            ],
            out_specs=pl.BlockSpec((tm, D), lambda i, j: (i, 0)),
            scratch_shapes=[pltpu.VMEM((tm, D), jnp.float32)],
            compiler_params=pltpu.CompilerParams(
                dimension_semantics=("parallel", "arbitrary"),
                vmem_limit_bytes=vmem_limit,
            ),
        )(x2d, w1, b1, w2, b2)

    return out2d[:M].reshape(B, S, D)


# ----------------------------------------------------------------------------
# Pure-JAX reference & demo
# ----------------------------------------------------------------------------
def reference(x, w1, b1, w2, b2):
    h = jnp.einsum("bsd,df->bsf", x, w1) + jnp.asarray(b1).reshape(-1)
    h = _gelu_tanh(h)
    return jnp.einsum("bsf,fd->bsd", h, w2) + jnp.asarray(b2).reshape(-1)


if __name__ == "__main__":
    B, S, D = 2, 8, 32
    Dff = 4 * D  # GPT-2 MLP inner size

    key = jax.random.PRNGKey(0)
    kx, kw1, kb1, kw2, kb2 = jax.random.split(key, 5)
    x = jax.random.normal(kx, (B, S, D), dtype=jnp.float32)
    # Weights stored (in, out);  c_fc: D -> 4D,  c_proj: 4D -> D.
    w1 = jax.random.normal(kw1, (D, Dff), dtype=jnp.float32) * 0.02
    b1 = jax.random.normal(kb1, (Dff,), dtype=jnp.float32) * 0.02
    w2 = jax.random.normal(kw2, (Dff, D), dtype=jnp.float32) * 0.02
    b2 = jax.random.normal(kb2, (D,), dtype=jnp.float32) * 0.02

    ref = reference(x, w1, b1, w2, b2)

    # Default dispatch (weight-resident fast path at these sizes).
    out = jax.block_until_ready(feed_forward(x, w1, b1, w2, b2))
    assert jnp.allclose(out, ref, atol=1e-4, rtol=1e-4), "resident path mismatch"

    # Also exercise the streaming fallback path.
    out_s = jax.block_until_ready(feed_forward(x, w1, b1, w2, b2, force_path="stream"))
    assert jnp.allclose(out_s, ref, atol=1e-4, rtol=1e-4), "streaming path mismatch"

    print("KERNEL_OK")
</pallas_src>

<mosaic_0001>
module attributes {stable_mosaic.version = 11 : i64} {
  func.func @ffn_resident_kernel(%arg0: i32, %arg1: memref<8x32xf32, #tpu.memory_space<vmem>>, %arg2: memref<32x128xf32, #tpu.memory_space<vmem>>, %arg3: memref<1x128xf32, #tpu.memory_space<vmem>>, %arg4: memref<128x32xf32, #tpu.memory_space<vmem>>, %arg5: memref<1x32xf32, #tpu.memory_space<vmem>>, %arg6: memref<8x32xf32, #tpu.memory_space<vmem>>, %arg7: memref<8x32xf32, #tpu.memory_space<vmem>>) attributes {dimension_semantics = [#tpu.dimension_semantics<parallel>], iteration_bounds = array<i64: 2>, scalar_prefetch = 0 : i64, scratch_operands = 1 : i64, tpu.core_type = #tpu.core_type<tc>, window_params = [{transform_indices = @transform_0, window_bounds = array<i64: 8, 32>}, {pipeline_mode = #tpu.pipeline_mode<synchronous>, transform_indices = @transform_1, window_bounds = array<i64: 32, 128>}, {pipeline_mode = #tpu.pipeline_mode<synchronous>, transform_indices = @transform_2, window_bounds = array<i64: 1, 128>}, {pipeline_mode = #tpu.pipeline_mode<synchronous>, transform_indices = @transform_3, window_bounds = array<i64: 128, 32>}, {pipeline_mode = #tpu.pipeline_mode<synchronous>, transform_indices = @transform_4, window_bounds = array<i64: 1, 32>}, {transform_indices = @transform_5, window_bounds = array<i64: 8, 32>}]} {
    %cst = arith.constant 0.000000e+00 : f32
    %0 = vector.broadcast %cst : f32 to vector<8x32xf32>
    %c0 = arith.constant 0 : index
    %c0_0 = arith.constant 0 : index
    %1 = vector.load %arg7[%c0, %c0_0] : memref<8x32xf32, #tpu.memory_space<vmem>>, vector<8x32xf32>
    tpu.vector_store %arg7[%c0, %c0_0], %0 {strides = array<i32>} : memref<8x32xf32, #tpu.memory_space<vmem>>, vector<8x32xf32>,
    %c0_1 = arith.constant 0 : index
    %c0_2 = arith.constant 0 : index
    %2 = vector.load %arg1[%c0_1, %c0_2] : memref<8x32xf32, #tpu.memory_space<vmem>>, vector<8x32xf32>
    %c0_i32 = arith.constant 0 : i32
    %c128_i32 = arith.constant 128 : i32
    %3 = arith.muli %c0_i32, %c128_i32 : i32
    %4 = tpu.assume_multiple %3, 128 : i32
    %c0_3 = arith.constant 0 : index
    %5 = arith.index_cast %4 : i32 to index
    %6 = vector.load %arg2[%c0_3, %5] : memref<32x128xf32, #tpu.memory_space<vmem>>, vector<32x128xf32>
    %cst_4 = arith.constant dense<0.000000e+00> : vector<8x128xf32>
    %7 = tpu.matmul %2, %6, %cst_4 {dimension_numbers = #tpu.dot_dimension_numbers<[1], [0], [0], [1], [0, 0, 1, 1], [], []>} : vector<8x32xf32>, vector<32x128xf32>, vector<8x128xf32> -> vector<8x128xf32>
    %c0_5 = arith.constant 0 : index
    %8 = arith.index_cast %4 : i32 to index
    %9 = vector.load %arg3[%c0_5, %8] : memref<1x128xf32, #tpu.memory_space<vmem>>, vector<1x128xf32>
    %10 = vector.broadcast %9 : vector<1x128xf32> to vector<8x128xf32>
    %11 = arith.addf %7, %10 : vector<8x128xf32>
    %cst_6 = arith.constant 5.000000e-01 : f32
    %12 = vector.broadcast %cst_6 : f32 to vector<8x128xf32>
    %13 = arith.mulf %12, %11 : vector<8x128xf32>
    %cst_7 = arith.constant 0.797884583 : f32
    %14 = vector.broadcast %cst_7 : f32 to vector<8x128xf32>
    %15 = arith.mulf %14, %11 : vector<8x128xf32>
    %16 = arith.mulf %11, %11 : vector<8x128xf32>
    %cst_8 = arith.constant 4.471500e-02 : f32
    %17 = vector.broadcast %cst_8 : f32 to vector<8x128xf32>
    %18 = arith.mulf %17, %16 : vector<8x128xf32>
    %cst_9 = arith.constant 1.000000e+00 : f32
    %19 = vector.broadcast %cst_9 : f32 to vector<8x128xf32>
    %20 = arith.addf %19, %18 : vector<8x128xf32>
    %21 = arith.mulf %15, %20 : vector<8x128xf32>
    %22 = math.tanh %21 : vector<8x128xf32>
    %cst_10 = arith.constant 1.000000e+00 : f32
    %23 = vector.broadcast %cst_10 : f32 to vector<8x128xf32>
    %24 = arith.addf %23, %22 : vector<8x128xf32>
    %25 = arith.mulf %13, %24 : vector<8x128xf32>
    %c0_11 = arith.constant 0 : index
    %c0_12 = arith.constant 0 : index
    %26 = vector.load %arg7[%c0_11, %c0_12] : memref<8x32xf32, #tpu.memory_space<vmem>>, vector<8x32xf32>
    %27 = arith.index_cast %4 : i32 to index
    %c0_13 = arith.constant 0 : index
    %28 = vector.load %arg4[%27, %c0_13] : memref<128x32xf32, #tpu.memory_space<vmem>>, vector<128x32xf32>
    %cst_14 = arith.constant dense<0.000000e+00> : vector<8x32xf32>
    %29 = tpu.matmul %25, %28, %cst_14 {dimension_numbers = #tpu.dot_dimension_numbers<[1], [0], [0], [1], [0, 0, 1, 1], [], []>} : vector<8x128xf32>, vector<128x32xf32>, vector<8x32xf32> -> vector<8x32xf32>
    %30 = arith.addf %26, %29 : vector<8x32xf32>
    %c0_15 = arith.constant 0 : index
    %c0_16 = arith.constant 0 : index
    %31 = vector.load %arg7[%c0_15, %c0_16] : memref<8x32xf32, #tpu.memory_space<vmem>>, vector<8x32xf32>
    tpu.vector_store %arg7[%c0_15, %c0_16], %30 {strides = array<i32>} : memref<8x32xf32, #tpu.memory_space<vmem>>, vector<8x32xf32>,
    %c1_i32 = arith.constant 1 : i32
    %c0_17 = arith.constant 0 : index
    %c0_18 = arith.constant 0 : index
    %32 = vector.load %arg7[%c0_17, %c0_18] : memref<8x32xf32, #tpu.memory_space<vmem>>, vector<8x32xf32>
    %c0_19 = arith.constant 0 : index
    %c0_20 = arith.constant 0 : index
    %33 = vector.load %arg5[%c0_19, %c0_20] : memref<1x32xf32, #tpu.memory_space<vmem>>, vector<1x32xf32>
    %34 = vector.broadcast %33 : vector<1x32xf32> to vector<8x32xf32>
    %35 = arith.addf %32, %34 : vector<8x32xf32>
    %c0_21 = arith.constant 0 : index
    %c0_22 = arith.constant 0 : index
    %36 = vector.load %arg6[%c0_21, %c0_22] : memref<8x32xf32, #tpu.memory_space<vmem>>, vector<8x32xf32>
    tpu.vector_store %arg6[%c0_21, %c0_22], %35 {strides = array<i32>} : memref<8x32xf32, #tpu.memory_space<vmem>>, vector<8x32xf32>,
    return
  }
  func.func @transform_0(%arg0: i32) -> (i32, i32) {
    %c0_i32 = arith.constant 0 : i32
    %c0_i32_0 = arith.constant 0 : i32
    return %arg0, %c0_i32 : i32, i32
  }
  func.func @transform_1(%arg0: i32) -> (i32, i32) {
    %c0_i32 = arith.constant 0 : i32
    %c0_i32_0 = arith.constant 0 : i32
    %c0_i32_1 = arith.constant 0 : i32
    return %c0_i32, %c0_i32_0 : i32, i32
  }
  func.func @transform_2(%arg0: i32) -> (i32, i32) {
    %c0_i32 = arith.constant 0 : i32
    %c0_i32_0 = arith.constant 0 : i32
    %c0_i32_1 = arith.constant 0 : i32
    return %c0_i32, %c0_i32_0 : i32, i32
  }
  func.func @transform_3(%arg0: i32) -> (i32, i32) {
    %c0_i32 = arith.constant 0 : i32
    %c0_i32_0 = arith.constant 0 : i32
    %c0_i32_1 = arith.constant 0 : i32
    return %c0_i32, %c0_i32_0 : i32, i32
  }
  func.func @transform_4(%arg0: i32) -> (i32, i32) {
    %c0_i32 = arith.constant 0 : i32
    %c0_i32_0 = arith.constant 0 : i32
    %c0_i32_1 = arith.constant 0 : i32
    return %c0_i32, %c0_i32_0 : i32, i32
  }
  func.func @transform_5(%arg0: i32) -> (i32, i32) {
    %c0_i32 = arith.constant 0 : i32
    %c0_i32_0 = arith.constant 0 : i32
    return %arg0, %c0_i32 : i32, i32
  }
}

</mosaic_0001>

<bundles_post_ra>
// kernel: tpu_custom_call.1
= control target key start
LH: loop header
LB: loop body
LE: loop exit
PB: predicated region body
PF: predicated region fallthrough
CT: control target
= control target key end

     0   :  { %10 = vsyncpa [#allocation4], 0  ;;  %s1377_s0 = inlined_call_operand.hbm [shape: f32[16,32], index: 0, kind: input, shape index: {}]   ;;  %s1378_s1 = inlined_call_operand.hbm [shape: f32[32,128], index: 1, kind: input, shape index: {}]   ;;  %s1379_s2 = inlined_call_operand.hbm [shape: f32[1,128], index: 2, kind: input, shape index: {}]   ;;  %s1380_s3 = inlined_call_operand.hbm [shape: f32[128,32], index: 3, kind: input, shape index: {}]   ;;  %s1381_s4 = inlined_call_operand.hbm [shape: f32[1,32], index: 4, kind: input, shape index: {}]   ;;  %s1382_s5 = inlined_call_operand.hbm [shape: f32[16,32], index: 5, kind: output, shape index: {}]  }
   0x1   :  { %12 = vsyncpa [#allocation4 + $0x1], 0 }
   0x2   :  { %13 = vsyncpa [#allocation7], 0 }
   0x3   :  { %14 = vsyncpa [#allocation10], 0 }
   0x4   :  { %15 = vsyncpa [#allocation5], 0 }
   0x5   :  { %17 = vsyncpa [#allocation5 + $0x1], 0  ;;  %s1085_s18 = smov 0   ;;  %s1087_s19 = smov 0  }
   0x6   :  { %s1089_s20 = smov 0   ;;  %s1091_s21 = smov 0  }
   0x7 LB: > { %s1044_s22 = smov [#allocation6]   ;;  %s1106_s24 = sadd.s32 4294967295, %s1042_s21   ;;  %s1042_s21 = sphi %s1091_s21, %s1406_s21   ;;  %s1038_s20 = sphi %s1089_s20, %s1405_s20   ;;  %s1034_s19 = sphi %s1087_s19, %s1404_s19   ;;  %s1030_s18 = sphi %s1085_s18, %s1403_s18  }
   0x8   : > { %s176_s23 = sshll.u32 %s1044_s22, 4  ;;  %p612_p0 = scmp.ge.s32.totalorder %s1042_s21, 1  ;;  %s1111_s23 = int_to_ptr.vmem [resolvable:$true] %s176_s23 }
   0x9   : > { %p1383_p1 = scmp.eq.s32.totalorder %s1106_s24, 0  ;;  %p164_p2 = scmp.lt.s32.totalorder %s1042_s21, 3 }
   0xa   : > { %s1045_s26 = smov [#allocation9]   ;;  %s1046_s29 = smov [#allocation8]  }
   0xb   : > { %p1113_p3 = pnand %p612_p0, %p164_p2  ;;  %s200_s27 = sshll.u32 %s1045_s26, 4  ;;  %s1126_s27 = int_to_ptr.vmem [resolvable:$true] %s200_s27 }
   0xc   : > { %s190_s30 = sshll.u32 %s1046_s29, 4  ;;  %s826_s8 = scalar_lea.hbm %s1378_s1, 512  ;;  %s1128_s30 = int_to_ptr.vmem [resolvable:$true] %s190_s30 }
   0xd   : > { %s1386_s25 = scalar_select %p1113_p3, 1, 0 }
   0xe   : > { %p752_p5 = pneg %p1113_p3  ;;  %p827_p7 = scmp.ne.s32.totalorder %s1378_s1, %s826_s8 }
   0xf   : > { %p833_p11 = scmp.lt.u32.totalorder %s826_s8, %s1378_s1 }
  0x10   : > { %p1122_p6 = pnand %p752_p5, %p1383_p1 }
  0x12   : > { %p1138_p8 = pneg %p1122_p6 }
  0x14   : > { %p829_p9 = pnand %p1138_p8, %p827_p7 }
  0x16   : > { %p830_p10 = pneg %p829_p9 }
  0x18   : > { %p835_p12 = pnand %p833_p11, %p830_p10 }
  0x1a   : > { %838 = shalt.err (!%p835_p12)
}
  0x1b   : > { %s839_s14 = scalar_lea.vmem %s1111_s23, 512  ;;  %p847_p5 = scmp.lt.s32.totalorder %s1111_s23, %s1111_s23 }
  0x1c   : > { %p840_p13 = scmp.ne.s32.totalorder %s1111_s23, %s839_s14  ;;  %p848_p4 = scmp.lt.s32.totalorder %s839_s14, %s839_s14 }
  0x1e   : > { %p842_p0 = pnand %p840_p13, %p1138_p8  ;;  %p849_p7 = por %p848_p4, %p847_p5 }
  0x20   : > { %p843_p2 = pneg %p842_p0 }
  0x22   : > { %p850_p9 = pnand %p849_p7, %p843_p2 }
  0x24   : > { %853 = shalt.err (!%p850_p9)
}
  0x25   : > { %s1047_s15 = smov 128   ;;  %s1048_s16 = smov 8  }
  0x26   : > { %755 = dma.hbm_to_vmem [thread:$0]  (!%p1122_p6), %s1378_s1, 512, %s1111_s23, [#allocation7], %s1047_s15, %s1047_s15, %s1048_s16  }
  0x27   : > { %s854_s6 = scalar_lea.hbm %s1380_s3, 2048 }
  0x28   : > { %p855_p4 = scmp.ne.s32.totalorder %s1380_s3, %s854_s6  ;;  %p861_p12 = scmp.lt.u32.totalorder %s854_s6, %s1380_s3 }
  0x2a   : > { %p857_p10 = pnand %p855_p4, %p1138_p8 }
  0x2c   : > { %p858_p11 = pneg %p857_p10 }
  0x2e   : > { %p863_p13 = pnand %p861_p12, %p858_p11 }
  0x30   : > { %866 = shalt.err (!%p863_p13)
}
  0x31   : > { %s867_s23 = scalar_lea.vmem %s1126_s27, 2048  ;;  %p875_p7 = scmp.lt.s32.totalorder %s1126_s27, %s1126_s27 }
  0x32   : > { %p868_p0 = scmp.ne.s32.totalorder %s1126_s27, %s867_s23  ;;  %p876_p9 = scmp.lt.s32.totalorder %s867_s23, %s867_s23 }
  0x34   : > { %p870_p2 = pnand %p868_p0, %p1138_p8  ;;  %p877_p4 = por %p876_p9, %p875_p7 }
  0x36   : > { %p871_p5 = pneg %p870_p2 }
  0x38   : > { %p878_p10 = pnand %p877_p4, %p871_p5 }
  0x3a   : > { %881 = shalt.err (!%p878_p10)
}
  0x3b   : > { %761 = dma.hbm_to_vmem [thread:$0]  (!%p1122_p6), %s1380_s3, 2048, %s1126_s27, [#allocation10], %s1047_s15, %s1047_s15, %s1048_s16  }
  0x3c   : > { %s882_s22 = scalar_lea.hbm %s1379_s2, 16 }
  0x3d   : > { %p883_p11 = scmp.ne.s32.totalorder %s1379_s2, %s882_s22  ;;  %p889_p0 = scmp.lt.u32.totalorder %s882_s22, %s1379_s2 }
  0x3f   : > { %p885_p12 = pnand %p883_p11, %p1138_p8 }
  0x41   : > { %p886_p13 = pneg %p885_p12 }
  0x43   : > { %p891_p2 = pnand %p889_p0, %p886_p13 }
  0x45   : > { %894 = shalt.err (!%p891_p2)
}
  0x46   : > { %s895_s27 = scalar_lea.vmem %s1128_s30, 16  ;;  %s902_s15 = scalar_lea.vmem %s1128_s30, 32 }
  0x47   : > { %p896_p5 = scmp.ne.s32.totalorder %s1128_s30, %s895_s27  ;;  %p903_p4 = scmp.lt.s32.totalorder %s1128_s30, %s1128_s30 }
  0x48   : > { %p904_p10 = scmp.lt.s32.totalorder %s902_s15, %s895_s27 }
  0x49   : > { %p898_p7 = pnand %p896_p5, %p1138_p8 }
  0x4a   : > { %p905_p11 = por %p904_p10, %p903_p4 }
  0x4b   : > { %p899_p9 = pneg %p898_p7 }
  0x4d   : > { %p906_p12 = pnand %p905_p11, %p899_p9 }
  0x4f   : > { %909 = shalt.err (!%p906_p12)
}
  0x50   : > { %758 = dma.hbm_to_vmem [thread:$0]  (!%p1122_p6), %s1379_s2, 16, %s1128_s30, [#allocation7]  }
  0x51   : > { %s1049_s9 = smov [#allocation11]   ;;  %s910_s13 = scalar_lea.hbm %s1381_s4, 16 }
  0x52   : > { %s214_s10 = sshll.u32 %s1049_s9, 4  ;;  %p911_p13 = scmp.ne.s32.totalorder %s1381_s4, %s910_s13  ;;  %s215_s10 = int_to_ptr.vmem [resolvable:$true] %s214_s10 }
  0x53   : > { %p917_p5 = scmp.lt.u32.totalorder %s910_s13, %s1381_s4 }
  0x54   : > { %p913_p0 = pnand %p911_p13, %p1138_p8 }
  0x56   : > { %p914_p2 = pneg %p913_p0 }
  0x58   : > { %p919_p7 = pnand %p917_p5, %p914_p2 }
  0x5a   : > { %922 = shalt.err (!%p919_p7)
}
  0x5b   : > { %s923_s30 = scalar_lea.vmem %s215_s10, 16  ;;  %s930_s29 = scalar_lea.vmem %s215_s10, 32 }
  0x5c   : > { %p924_p9 = scmp.ne.s32.totalorder %s215_s10, %s923_s30  ;;  %p931_p11 = scmp.lt.s32.totalorder %s215_s10, %s215_s10 }
  0x5d   : > { %p932_p12 = scmp.lt.s32.totalorder %s930_s29, %s923_s30 }
  0x5e   : > { %p926_p4 = pnand %p924_p9, %p1138_p8 }
  0x5f   : > { %p933_p1 = por %p932_p12, %p931_p11 }
  0x60   : > { %p927_p10 = pneg %p926_p4 }
  0x62   : > { %p934_p3 = pnand %p933_p1, %p927_p10 }
  0x64   : > { %937 = shalt.err (!%p934_p3)
}
  0x65   : > { %764 = dma.hbm_to_vmem [thread:$0]  (!%p1122_p6), %s1381_s4, 16, %s215_s10, [#allocation10]  }
  0x66   : > { %s611_s11 = sadd.s32 4294967294, %s1042_s21   ;;  %s1226_s28 = sadd.s32 1, %s1042_s21  }
  0x67   : > { %s27_s27 = ssub.s32 %s1042_s21, %s1226_s28  ;;  %s30_s15 = sadd.s32 1, %s1038_s20 }
  0x68   : > { %p28_p1 = scmp.eq.s32.totalorder %s27_s27, 0  ;;  %p37_p3 = scmp.ne.s32.totalorder %s1038_s20, %s1034_s19 }
  0x69   : > { %p38_p8 = scmp.eq.s32.totalorder %s1042_s21, 0  ;;  %p43_p13 = scmp.ne.s32.totalorder %s1034_s19, %s1030_s18 }
  0x6a   : > { %s1237_s16 = scalar_select %p28_p1, %s1038_s20, %s30_s15  }
  0x6b   : > { %p1239_p0 = por %p38_p8, %p37_p3  ;;  %p1390_p2 = scmp.eq.s32.totalorder %s1106_s24, 0 }
  0x6c   : > { %p151_p5 = scmp.eq.s32.totalorder %s1106_s24, 1  ;;  %p157_p7 = scmp.eq.s32.totalorder %s611_s11, 1 }
  0x6d   : > { %p1245_p6 = por %p1390_p2, %p43_p13  ;;  %p777_p9 = scmp.lt.s32.totalorder %s1042_s21, 2 }
  0x6e   : > { %s225_s10 = sand.u32 1, %s1038_s20   ;;  %p1252_p4 = por %p151_p5, %p37_p3 }
  0x6f   : > { %p1256_p10 = por %p157_p7, %p43_p13  ;;  %s618_s13 = sshll.u32 %s225_s10, 3 }
  0x70   : > { %s1392_s23 = scalar_select %p1252_p4, 1, 0 }
  0x71   : > { %s1393_s12 = scalar_select %p1256_p10, 1, 0 }
  0x72   : > { %s619_s14 = sshll.u32 %s1042_s21, 7  ;;  %s229_s30 = scalar_lea.vmem [#allocation3], %s618_s13 }
  0x73   : > { %s1264_s26 = scalar_lea.hbm %s1377_s0, %s619_s14  ;;  %s236_s29 = sshll.u32 %s229_s30, 4  ;;  %s1266_s29 = int_to_ptr.vmem [resolvable:$true] %s236_s29 }
  0x74   : > { %p1270_p11 = pnand %p777_p9, %p1239_p0  ;;  %s226_s7 = scalar_lea.sflag [#allocation4], %s225_s10 }
  0x75   : > { %s938_s11 = scalar_lea.hbm %s1264_s26, 128  ;;  %s943_s13 = scalar_lea.hbm %s1377_s0, 256 }
  0x76   : > { %p939_p12 = scmp.ne.s32.totalorder %s1264_s26, %s938_s11  ;;  %p940_p1 = pneg %p1270_p11 }
  0x77   : > { %p944_p13 = scmp.lt.u32.totalorder %s1264_s26, %s1377_s0  ;;  %p945_p0 = scmp.lt.u32.totalorder %s943_s13, %s938_s11 }
  0x78   : > { %p941_p3 = pnand %p940_p1, %p939_p12  ;;  %p947_p5 = scmp.lt.u32.totalorder %s938_s11, %s1264_s26 }
  0x79   : > { %p946_p2 = por %p945_p0, %p944_p13 }
  0x7a   : > { %p942_p8 = pneg %p941_p3 }
  0x7b   : > { %p948_p7 = por %p947_p5, %p946_p2 }
  0x7d   : > { %p949_p9 = pnand %p948_p7, %p942_p8 }
  0x7f   : > { %952 = shalt.err (!%p949_p9)
}
  0x80   : > { %s953_s10 = scalar_lea.vmem %s1266_s29, 128  ;;  %s1050_s17 = smov [#allocation3]  }
  0x81   : > { %p954_p12 = scmp.ne.s32.totalorder %s1266_s29, %s953_s10  ;;  %s958_s22 = sshll.u32 %s1050_s17, 4  ;;  %s959_s22 = int_to_ptr.vmem [resolvable:$false] %s958_s22 }
  0x82   : > { %s960_s30 = scalar_lea.vmem %s959_s22, 256  ;;  %p961_p4 = scmp.lt.s32.totalorder %s1266_s29, %s959_s22 }
  0x83   : > { %p956_p3 = pnand %p954_p12, %p940_p1  ;;  %p962_p13 = scmp.lt.s32.totalorder %s960_s30, %s953_s10 }
  0x85   : > { %p957_p10 = pneg %p956_p3  ;;  %p963_p0 = por %p962_p13, %p961_p4 }
  0x87   : > { %p964_p2 = pnand %p963_p0, %p957_p10 }
  0x89   : > { %967 = shalt.err (!%p964_p2)
}
  0x8a   : > { %768 = dma.hbm_to_vmem [thread:$0]  (!%p1270_p11), %s1264_s26, 128, %s1266_s29, %s226_s7  }
  0x8b   : > { %p1395_p8 = scmp.ne.s32.totalorder %s1386_s25, 0 }
  0x8c   : > { %s1302_s11 = sand.u32 (!%p1395_p8), 1, %s1034_s19  }
  0x8d   : > { %245 = sbr.rel (%p1395_p8) target bundleno = 640 (0x280), region = 40  ;;  %s621_s27 = sshll.u32 (!%p1395_p8), %s1302_s11, 3 }
  0x8e   : > { %s248_s15 = scalar_lea.sflag (!%p1395_p8), [#allocation4], %s1302_s11  ;;  %s1308_s13 = scalar_lea.vmem (!%p1395_p8), [#allocation3], %s621_s27 }
  0x94   : > { %1013 = dma.done.wait (%p1245_p6), %s248_s15, 128  }
  0x95   : > { %1015 = vsyncadd (%p1245_p6), %s248_s15, 4294967168  ;;  %p1396_p4 = scmp.eq.s32.totalorder %s1106_s24, 0 }
  0x97   : > { %1017 = dma.done.wait (%p1396_p4), [#allocation7], 528   ;;  %p1397_p10 = pmov %p1396_p4 }
  0x98   : > { %p1398_p11 = pmov %p1396_p4 }
  0x99   : > { %1019 = vsyncadd (%p1397_p10), [#allocation7], 4294966768 }
  0x9a   : > { %1021 = dma.done.wait (%p1398_p11), [#allocation10], 2064   ;;  %p1399_p1 = pmov %p1396_p4 }
  0x9b   : > { %vm294_vm0 = vcmask 261120   ;;  %v1051_v0 = vmov 0.0|0.0   ;;  %vm1052_vm1 = vmmov 0   ;;  %v1053_v1 = vmov 0.0   ;;  %v297_v2 = vld [vmem:[#allocation6] sm:$0xff]  ;;  %v298_v3 = vld [vmem:[#allocation6 + $0x8] sm:$0xff] }
  0x9c   : > { %1023 = vsyncadd (%p1399_p1), [#allocation10], 4294965232  ;;  %702 = vmatprep.subr.bf16.mxu0 %v1051_v0  ;;  %664 = vmatprep.mubr.msk.f32.mxu0 %vm1052_vm1, %v1053_v1  ;;  %295 = vst.msk [vmem:[#allocation2] sm:$0xff] %vm294_vm0, %v1053_v1  ;;  %v299_v4 = vld [vmem:[#allocation6 + $0x10] sm:$0xff]  ;;  %v703_v5 = vpack.c.bf16 %v298_v3, %v297_v2  ;;  %v300_v6 = vld [vmem:[#allocation6 + $0x18] sm:$0xff]  ;;  %s631_s25 = sshll.u32 %s1106_s24, 7 }
  0x9d   : > { %708 = vmatprep.subr.bf16.mxu1 %v1051_v0  ;;  %699 = vmatprep.mubr.msk.f32.mxu1 %vm1052_vm1, %v1053_v1  ;;  %v391_v7 = vld [vmem:[#allocation9] sm:$0xff]  ;;  %v392_v8 = vld [vmem:[#allocation9 + $0x8] sm:$0xff]  ;;  %v393_v9 = vld [vmem:[#allocation9 + $0x10] sm:$0xff]  ;;  %v706_v11 = vpack.c.bf16 %v300_v6, %v299_v4  ;;  %s293_s9 = scalar_lea.vmem [#allocation12], %s621_s27  ;;  %s1332_s7 = scalar_lea.hbm %s1382_s5, %s631_s25 }
  0x9e   : > { %v394_v10 = vld [vmem:[#allocation9 + $0x18] sm:$0xff]  ;;  %704 = vmatpush3.bf16.msra.mxu0 %v703_v5  ;;  %v709_v12 = vpack.c.bf16 %v392_v8, %v391_v7  ;;  %v395_v15 = vld [vmem:[#allocation9 + $0x20] sm:$0xff]  ;;  %v396_v16 = vld [vmem:[#allocation9 + $0x28] sm:$0xff]  ;;  %s503_s26 = sshll.u32 %s293_s9, 4  ;;  %s490_s8 = scalar_lea.sflag [#allocation5], %s1302_s11  ;;  %s1334_s26 = int_to_ptr.vmem [resolvable:$true] %s503_s26 }
  0x9f   : > { %705 = vmatprep.subr.bf16.mxu0 %v1051_v0  ;;  %v712_v13 = vpack.c.bf16 %v394_v10, %v393_v9  ;;  %v296_v14 = vld [vmem:[%s1308_s13] sm:$0xff]  ;;  %v715_v17 = vpack.c.bf16 %v396_v16, %v395_v15  ;;  %v399_v21 = vld [vmem:[#allocation9 + $0x40] sm:$0xff]  ;;  %v627_v33 = vld [vmem:[#allocation8] ss:$0 sm:$0xff]  ;;  %s968_s14 = scalar_lea.vmem %s1334_s26, 128  ;;  %p1400_p5 = scmp.ne.s32.totalorder %s1392_s23, 0 }
  0xa0   : > { %710 = vmatpush3.bf16.msra.mxu1 %v709_v12  ;;  %v397_v18 = vld [vmem:[#allocation9 + $0x30] sm:$0xff]  ;;  %v398_v19 = vld [vmem:[#allocation9 + $0x38] sm:$0xff]  ;;  %v400_v22 = vld [vmem:[#allocation9 + $0x48] sm:$0xff]  ;;  %p969_p6 = scmp.ne.s32.totalorder %s1334_s26, %s968_s14  ;;  %s1054_s24 = smov [#allocation12]  }
  0xa1   : > { %711 = vmatprep.subr.bf16.mxu1 %v1051_v0  ;;  %v718_v20 = vpack.c.bf16 %v398_v19, %v397_v18  ;;  %v721_v23 = vpack.c.bf16 %v400_v22, %v399_v21  ;;  %v401_v24 = vld [vmem:[#allocation9 + $0x50] sm:$0xff]  ;;  %v402_v25 = vld [vmem:[#allocation9 + $0x58] sm:$0xff]  ;;  %v403_v27 = vld [vmem:[#allocation9 + $0x60] sm:$0xff]  ;;  %s972_s10 = sshll.u32 %s1054_s24, 4  ;;  %s973_s10 = int_to_ptr.vmem [resolvable:$false] %s972_s10 }
  0xa2   : > { %707 = vmatpush3.bf16.msra.mxu0 %v706_v11  ;;  %v724_v26 = vpack.c.bf16 %v402_v25, %v401_v24  ;;  %v404_v28 = vld [vmem:[#allocation9 + $0x68] sm:$0xff]  ;;  %v405_v30 = vld [vmem:[#allocation9 + $0x70] sm:$0xff]  ;;  %v406_v31 = vld [vmem:[#allocation9 + $0x78] sm:$0xff]  ;;  %p970_p7 = pnand %p969_p6, %p1400_p5  ;;  %s974_s17 = scalar_lea.vmem %s973_s10, 256 }
  0xa3   : > { %v727_v29 = vpack.c.bf16 %v404_v28, %v403_v27  ;;  %v730_v32 = vpack.c.bf16 %v406_v31, %v405_v30  ;;  %v390_v46 = vld [vmem:[#allocation2] sm:$0xff]  ;;  %v629_v50 = vld [vmem:[#allocation11] ss:$0 sm:$0xff]  ;;  %p975_p12 = scmp.lt.s32.totalorder %s1334_s26, %s973_s10  ;;  %p976_p3 = scmp.lt.s32.totalorder %s974_s17, %s968_s14 }
  0xa4   : > { %713 = vmatpush3.bf16.msra.mxu1 %v712_v13  ;;  %p971_p9 = pneg %p970_p7 }
  0xa5   : > { %665 = vmatmul.mubr.msk.f32.vlgmr.msra.gmra.mrb[0].mxu0 %vm294_vm0, %v296_v14  ;;  %714 = vmatprep.subr.bf16.mxu1 %v1051_v0  ;;  %p977_p13 = por %p976_p3, %p975_p12 }
  0xa7   : > { %p978_p0 = pnand %p977_p13, %p971_p9 }
  0xa8   : > { %716 = vmatpush3.bf16.msra.mxu1 %v715_v17 }
  0xa9   : > { %717 = vmatprep.subr.bf16.mxu1 %v1051_v0 }
  0xac   : > { %719 = vmatpush3.bf16.msra.mxu1 %v718_v20 }
  0xad   : > { %720 = vmatprep.subr.bf16.mxu1 %v1051_v0 }
  0xb0   : > { %722 = vmatpush3.bf16.msra.mxu1 %v721_v23 }
  0xb1   : > { %723 = vmatprep.subr.bf16.mxu1 %v1051_v0 }
  0xb4   : > { %725 = vmatpush3.bf16.msra.mxu1 %v724_v26 }
  0xb5   : > { %726 = vmatprep.subr.bf16.mxu1 %v1051_v0 }
  0xb8   : > { %728 = vmatpush3.bf16.msra.mxu1 %v727_v29 }
  0xb9   : > { %729 = vmatprep.subr.bf16.mxu1 %v1051_v0 }
  0xbc   : > { %731 = vmatpush3.bf16.msra.mxu1 %v730_v32 }
 0x178   : > { %v377_v34 = vpop.f32.mrb[0].mxu0 }
 0x179   : > { %v378_v35 = vadd.f32 %v627_v33, %v377_v34  ;;  %v666_v36 = vpop.f32.mrb[1].mxu0 }
 0x17b   : > { %v383_v37 = vmul.f32 %v378_v35, %v378_v35  ;;  %v382_v39 = vmul.f32 0.7978846, %v378_v35  ;;  %v381_v43 = vmul.f32 0.5, %v378_v35 }
 0x17d   : > { %v384_v38 = vmul.f32 0.044715, %v383_v37 }
 0x17f   : > { %v385_v40 = vadd.f32 1.0, %v384_v38 }
 0x181   : > { %v386_v41 = vmul.f32 %v385_v40, %v382_v39 }
 0x183   : > { %824 = vtanh.f32 %v386_v41 }
 0x18d   : > { %v825_v42 = vpop.eup %824 }
 0x18e   : > { %v388_v44 = vadd.f32 1.0, %v825_v42 }
 0x190   : > { %v389_v45 = vmul.f32 %v388_v44, %v381_v43 }
 0x192   : > { %700 = vmatmul.mubr.f32.vlgmr.msra.gmra.mrb[0].mxu1 %v389_v45 }
 0x265   : > { %v473_v47 = vpop.f32.mrb[0].mxu1 }
 0x266   : > { %v477_v48 = vadd.f32 %v473_v47, %v390_v46  ;;  %v701_v49 = vpop.f32.mrb[1].mxu1 }
 0x268   : > { %478 = vst.msk [vmem:[#allocation2] sm:$0xff] %vm294_vm0, %v477_v48 }
 0x26f   : > { %v479_v51 = vld [vmem:[#allocation2] sm:$0xff] }
 0x270   : > { %v487_v52 = vadd.f32 %v629_v50, %v479_v51 }
 0x272   : > { %488 = vst.msk [vmem:[%s293_s9] sm:$0xff] %vm294_vm0, %v487_v52 }
 0x273   : > { %981 = shalt.err (!%p978_p0)
}
 0x274   : > { %s982_s22 = scalar_lea.hbm %s1332_s7, 128  ;;  %s986_s27 = scalar_lea.hbm %s1382_s5, 256 }
 0x275   : > { %p983_p2 = scmp.ne.s32.totalorder %s1332_s7, %s982_s22  ;;  %p987_p10 = scmp.lt.u32.totalorder %s1332_s7, %s1382_s5 }
 0x276   : > { %p988_p11 = scmp.lt.u32.totalorder %s986_s27, %s982_s22  ;;  %p990_p6 = scmp.lt.u32.totalorder %s982_s22, %s1332_s7 }
 0x277   : > { %p984_p8 = pnand %p983_p2, %p1400_p5 }
 0x278   : > { %p989_p1 = por %p988_p11, %p987_p10 }
 0x279   : > { %p985_p4 = pneg %p984_p8 }
 0x27a   : > { %p991_p7 = por %p990_p6, %p989_p1 }
 0x27c   : > { %p992_p9 = pnand %p991_p7, %p985_p4 }
 0x27e   : > { %995 = shalt.err (!%p992_p9)
}
 0x27f   : > { %750 = dma.vmem_to_hbm [thread:$0]  (%p1400_p5), %s1334_s26, 128, %s1332_s7, %s490_s8  }
 0x280 PF: > { %s515_s25 = sand.u32 1, %s1030_s18   ;;  %p1401_p12 = scmp.ne.s32.totalorder %s1393_s12, 0 }
 0x281   : > { %p1402_p3 = scmp.ge.s32.totalorder %s1042_s21, 2  ;;  %s516_s9 = scalar_lea.sflag [#allocation5], %s515_s25 }
 0x283   : > { %p770_p13 = pnand %p1402_p3, %p1401_p12 }
 0x285   : > { %1025 = dma.done.wait (!%p770_p13), %s516_s9, 128  }
 0x286   : > { %1027 = vsyncadd (!%p770_p13), %s516_s9, 4294967168  ;;  %p20_p0 = scmp.ge.s32.totalorder %s1226_s28, 4   ;;  %s1403_s18 = smov %s1034_s19 }
 0x287   : > { %s1404_s19 = smov %s1038_s20  ;;  %s1405_s20 = smov %s1237_s16 }
 0x288   : > { %s1406_s21 = smov %s1226_s28  ;;  %22 = sbr.rel (!%p20_p0) target bundleno = 7 (0x7), region = 101 }
 0x28f   :  { %521 = vsyncpa [#allocation4], 1 }
 0x290   :  { %523 = vsyncpa [#allocation4 + $0x1], 1 }
 0x291   :  { %524 = vsyncpa [#allocation7], 1 }
 0x292   :  { %525 = vsyncpa [#allocation10], 1 }
 0x293   :  { %526 = vsyncpa [#allocation5], 1 }
 0x294   :  { %528 = vsyncpa [#allocation5 + $0x1], 1 }

</bundles_post_ra>
